<compile_context>
chip_gen: v7x
topology: tpu7x:2x2x1
jax: 0.10.0
libtpu: 0.0.40
codegen_flags: <defaults>
</compile_context>

<pallas_src>
import math
from functools import partial

import jax
import jax.numpy as jnp
from jax import lax
from jax.experimental import pallas as pl
from jax.experimental.pallas import tpu as pltpu


def _sdpa_kernel(q_ref, k_ref, v_ref, mask_ref, out_ref, attn_ref, *, scale, mxu_dtype):
    # q_ref:   (1, tq, d_k)  query tile
    # k_ref:   (1, S,  d_k)  full keys of this head (resident across q tiles)
    # v_ref:   (1, S,  d_k)  full values of this head
    # mask_ref:(1, tq, S)    mask tile in its native dtype (0 = masked out)
    q = (q_ref[0] * scale).astype(mxu_dtype)   # fold 1/sqrt(d_k) into Q -> (tq, d_k)
    k = k_ref[0].astype(mxu_dtype)             # (S, d_k)
    v = v_ref[0].astype(mxu_dtype)             # (S, d_k)
    m = mask_ref[0]                            # (tq, S)

    # scores = (Q*scale) @ K^T: contract d_k directly (MXU handles the transposed-RHS
    # contraction; no explicit k.T / XLU transpose), f32 accumulation.
    scores = lax.dot_general(
        q, k,
        dimension_numbers=(((1,), (1,)), ((), ())),
        preferred_element_type=jnp.float32,
    )                                          # (tq, S) f32

    # masked_fill(mask == 0, -1e9); compare in the mask's native dtype.
    scores = jnp.where(m != 0, scores, jnp.float32(-1.0e9))

    # Numerically stable softmax over the key axis (matches F.softmax).  Exact
    # normalization: the reciprocal is only over the (tq, 1) row sums, so it is cheap,
    # and the returned weights sum to 1 per row.
    row_max = jnp.max(scores, axis=-1, keepdims=True)
    exp_scores = jnp.exp(scores - row_max)
    denom = jnp.sum(exp_scores, axis=-1, keepdims=True)
    weights = exp_scores * (1.0 / denom)       # (tq, S) f32

    # output = attention_weights @ V on the MXU, f32 accumulation.
    out = jnp.dot(weights.astype(mxu_dtype), v, preferred_element_type=jnp.float32)

    out_ref[0] = out.astype(out_ref.dtype)
    attn_ref[0] = weights.astype(attn_ref.dtype)


def _vmem_capacity_bytes():
    try:
        return int(pltpu.get_tpu_info().vmem_capacity_bytes)
    except Exception:
        return 128 << 20   # v5e/v6e physical VMEM; also the interpret/CPU fallback.


def _pick_q_tile(S):
    """MXU/(8,128)-friendly query tile, generation-aware (v7x has only 64 MiB VMEM)."""
    small_vmem = _vmem_capacity_bytes() <= (64 << 20)      # v7x-class chip
    if S % 256 == 0 and S >= 256 and not (small_vmem and S >= 8192):
        return 256
    if S % 128 == 0:
        return 128
    return S   # block == full dim is always a legal block shape


def scaled_dot_product_attention(query, key, value, mask, *, q_tile=None,
                                 mxu_dtype=None, attn_dtype=None):
    """query/key/value: [B, H, S, d_k]; mask: [B|1, H|1, S, S] (nonzero = keep).

    Returns (output [B,H,S,d_k], attention_weights [B,H,S,S]) — the PyTorch module's
    forward with dropout=None.

    mxu_dtype:  dtype the matmul operands are cast to.  Default bf16 for f32 inputs
                (bf16-native MXU on v5e/v6e/v7x) with f32 accumulation; pass
                jnp.float32 for bit-tight results.
    attn_dtype: dtype of the returned attention weights (default: input dtype).
                jnp.bfloat16 halves the dominant O(S^2) writeback.
    """
    B, H, S, d_k = query.shape
    BH = B * H
    dtype = query.dtype
    if mxu_dtype is None:
        mxu_dtype = jnp.bfloat16 if dtype == jnp.float32 else dtype
    if attn_dtype is None:
        attn_dtype = dtype

    q = query.reshape(BH, S, d_k)
    k = key.reshape(BH, S, d_k)
    v = value.reshape(BH, S, d_k)

    # Mask: no wrapper-side cast / materialization; pass native dtype, compare in-kernel.
    Bm, Hm, Sm1, Sm2 = mask.shape
    assert (Sm1, Sm2) == (S, S), "mask must be [*, *, S, S]"
    assert Bm in (1, B) and Hm in (1, H), "mask batch/head dims must be 1 or match"
    m = mask.reshape(Bm * Hm, S, S)

    if q_tile is None:
        q_tile = _pick_q_tile(S)
    assert S % q_tile == 0
    n_q = S // q_tile
    scale = 1.0 / math.sqrt(d_k)

    # Grid: (head, q-tile).  K/V index_maps are constant in the inner axis -> resident.
    q_spec = pl.BlockSpec((1, q_tile, d_k), lambda i, j: (i, j, 0))
    kv_spec = pl.BlockSpec((1, S, d_k), lambda i, j: (i, 0, 0))
    if Bm == B and Hm == H:
        mask_idx = lambda i, j: (i, j, 0)
    elif Bm == 1 and Hm == 1:
        mask_idx = lambda i, j: (0, j, 0)          # resident across heads too
    elif Bm == 1:                                   # [1, H, S, S]
        mask_idx = lambda i, j: (i % H, j, 0)
    else:                                           # [B, 1, S, S]
        mask_idx = lambda i, j: (i // H, j, 0)
    mask_spec = pl.BlockSpec((1, q_tile, S), mask_idx)
    out_spec = pl.BlockSpec((1, q_tile, d_k), lambda i, j: (i, j, 0))
    attn_spec = pl.BlockSpec((1, q_tile, S), lambda i, j: (i, j, 0))

    # Explicit VMEM budget: double-buffered blocks + f32 score temporaries, with
    # margin, capped at 75% of physical VMEM (64 MiB on v7x, 128 MiB on v5e/v6e).
    isz = jnp.dtype(dtype).itemsize
    mask_isz = jnp.dtype(mask.dtype).itemsize
    attn_isz = jnp.dtype(attn_dtype).itemsize
    block_bytes = (
        2 * q_tile * d_k * isz          # q (double-buffered)
        + 2 * 2 * S * d_k * isz         # k, v
        + 2 * q_tile * S * mask_isz     # mask
        + 2 * q_tile * d_k * isz        # out
        + 2 * q_tile * S * attn_isz     # attn
    )
    temp_bytes = 4 * q_tile * S * 4     # f32 scores / exp / weights temporaries
    cap = _vmem_capacity_bytes()
    vmem_limit = max(
        min(int(1.5 * (block_bytes + temp_bytes)) + (8 << 20), int(0.75 * cap)),
        32 << 20,
    )

    # Advisory cost estimate so XLA can schedule surrounding ops around the kernel.
    cost = pl.CostEstimate(
        flops=4 * BH * S * S * d_k,
        transcendentals=BH * S * S,
        bytes_accessed=(3 * BH * S * d_k * isz       # q, k, v reads
                        + m.size * mask_isz          # mask read
                        + BH * S * d_k * isz         # output write
                        + BH * S * S * attn_isz),    # attention-weights write
    )

    out, attn = pl.pallas_call(
        partial(_sdpa_kernel, scale=scale, mxu_dtype=mxu_dtype),
        out_shape=(
            jax.ShapeDtypeStruct((BH, S, d_k), dtype),
            jax.ShapeDtypeStruct((BH, S, S), attn_dtype),
        ),
        grid_spec=pltpu.PrefetchScalarGridSpec(
            num_scalar_prefetch=0,
            grid=(BH, n_q),
            in_specs=[q_spec, kv_spec, kv_spec, mask_spec],
            out_specs=[out_spec, attn_spec],
        ),
        compiler_params=pltpu.CompilerParams(
            # BH is the megacore axis; keeping the inner q-tile axis "arbitrary"
            # means a v7x core never duplicates the resident K/V DMA.
            dimension_semantics=("parallel", "arbitrary"),
            vmem_limit_bytes=vmem_limit,
        ),
        cost_estimate=cost,
    )(q, k, v, m)

    return out.reshape(B, H, S, d_k), attn.reshape(B, H, S, S)


if __name__ == "__main__":
    # Small deterministic example consistent with the module's forward signature.
    B, H, S, d_k = 2, 4, 8, 32

    key0 = jax.random.PRNGKey(0)
    kq, kk, kv = jax.random.split(key0, 3)

    query = jax.random.normal(kq, (B, H, S, d_k), dtype=jnp.float32)
    keyt = jax.random.normal(kk, (B, H, S, d_k), dtype=jnp.float32)
    value = jax.random.normal(kv, (B, H, S, d_k), dtype=jnp.float32)
    # Causal-style 0/1 mask, full [B, H, S, S] as in the PyTorch module.
    causal = jnp.tril(jnp.ones((S, S), dtype=jnp.float32))
    mask = jnp.broadcast_to(causal, (B, H, S, S))

    # Reference in plain JAX (same math as the PyTorch module with dropout=None).
    scores_ref = jnp.einsum("bhqd,bhkd->bhqk", query, keyt) / math.sqrt(d_k)
    scores_ref = jnp.where(mask == 0, -1.0e9, scores_ref)
    attn_ref = jax.nn.softmax(scores_ref, axis=-1)
    out_ref = jnp.einsum("bhqk,bhkd->bhqd", attn_ref, value)

    # 1) Exact-math path (f32 MXU operands): tight semantic check.
    out32, attn32 = scaled_dot_product_attention(query, keyt, value, mask,
                                                 mxu_dtype=jnp.float32)
    jax.block_until_ready((out32, attn32))
    assert jnp.allclose(out32, out_ref, atol=2e-3, rtol=2e-3), "f32 output mismatch"
    assert jnp.allclose(attn32, attn_ref, atol=2e-3, rtol=2e-3), "f32 attn mismatch"

    # 2) Default fast path (bf16 MXU operands, f32 accumulation): looser tolerance
    #    accounts for bf16 rounding of the matmul inputs (the exactness of the math
    #    itself is established by the f32 check above).
    out_fast, attn_fast = scaled_dot_product_attention(query, keyt, value, mask)
    jax.block_until_ready((out_fast, attn_fast))
    assert jnp.allclose(out_fast, out_ref, atol=5e-2, rtol=5e-2), "bf16 output mismatch"
    assert jnp.allclose(attn_fast, attn_ref, atol=3e-2, rtol=3e-2), "bf16 attn mismatch"

    print("KERNEL_OK")
</pallas_src>

<mosaic_0001>
module attributes {stable_mosaic.version = 11 : i64} {
  func.func @_sdpa_kernel(%arg0: i32, %arg1: i32, %arg2: memref<1x8x32xf32, #tpu.memory_space<vmem>>, %arg3: memref<1x8x32xf32, #tpu.memory_space<vmem>>, %arg4: memref<1x8x32xf32, #tpu.memory_space<vmem>>, %arg5: memref<1x8x8xf32, #tpu.memory_space<vmem>>, %arg6: memref<1x8x32xf32, #tpu.memory_space<vmem>>, %arg7: memref<1x8x8xf32, #tpu.memory_space<vmem>>) attributes {dimension_semantics = [#tpu.dimension_semantics<parallel>, #tpu.dimension_semantics<arbitrary>], iteration_bounds = array<i64: 8, 1>, scalar_prefetch = 0 : i64, scratch_operands = 0 : i64, tpu.core_type = #tpu.core_type<tc>, window_params = [{transform_indices = @transform_0, window_bounds = array<i64: 1, 8, 32>}, {transform_indices = @transform_1, window_bounds = array<i64: 1, 8, 32>}, {transform_indices = @transform_2, window_bounds = array<i64: 1, 8, 32>}, {transform_indices = @transform_3, window_bounds = array<i64: 1, 8, 8>}, {transform_indices = @transform_4, window_bounds = array<i64: 1, 8, 32>}, {transform_indices = @transform_5, window_bounds = array<i64: 1, 8, 8>}]} {
    %c0 = arith.constant 0 : index
    %c0_0 = arith.constant 0 : index
    %c0_1 = arith.constant 0 : index
    %0 = vector.load %arg2[%c0, %c0_0, %c0_1] : memref<1x8x32xf32, #tpu.memory_space<vmem>>, vector<1x8x32xf32>
    %1 = vector.shape_cast %0 : vector<1x8x32xf32> to vector<8x32xf32>
    %cst = arith.constant 0.176776692 : f32
    %2 = vector.broadcast %cst : f32 to vector<8x32xf32>
    %3 = arith.mulf %1, %2 : vector<8x32xf32>
    %c0_2 = arith.constant 0 : index
    %c0_3 = arith.constant 0 : index
    %c0_4 = arith.constant 0 : index
    %4 = vector.load %arg3[%c0_2, %c0_3, %c0_4] : memref<1x8x32xf32, #tpu.memory_space<vmem>>, vector<1x8x32xf32>
    %5 = vector.shape_cast %4 : vector<1x8x32xf32> to vector<8x32xf32>
    %c0_5 = arith.constant 0 : index
    %c0_6 = arith.constant 0 : index
    %c0_7 = arith.constant 0 : index
    %6 = vector.load %arg4[%c0_5, %c0_6, %c0_7] : memref<1x8x32xf32, #tpu.memory_space<vmem>>, vector<1x8x32xf32>
    %7 = vector.shape_cast %6 : vector<1x8x32xf32> to vector<8x32xf32>
    %c0_8 = arith.constant 0 : index
    %c0_9 = arith.constant 0 : index
    %c0_10 = arith.constant 0 : index
    %8 = vector.load %arg5[%c0_8, %c0_9, %c0_10] : memref<1x8x8xf32, #tpu.memory_space<vmem>>, vector<1x8x8xf32>
    %9 = vector.shape_cast %8 : vector<1x8x8xf32> to vector<8x8xf32>
    %cst_11 = arith.constant dense<0.000000e+00> : vector<8x8xf32>
    %10 = tpu.matmul %3, %5, %cst_11 {dimension_numbers = #tpu.dot_dimension_numbers<[1], [1], [0], [0], [0, 0, 1, 0], [], []>} : vector<8x32xf32>, vector<8x32xf32>, vector<8x8xf32> -> vector<8x8xf32>
    %cst_12 = arith.constant 0.000000e+00 : f32
    %11 = vector.broadcast %cst_12 : f32 to vector<8x8xf32>
    %12 = arith.cmpf one, %9, %11 : vector<8x8xf32>
    %cst_13 = arith.constant -1.000000e+09 : f32
    %13 = vector.broadcast %cst_13 : f32 to vector<8x8xf32>
    %14 = arith.select %12, %10, %13 : vector<8x8xi1>, vector<8x8xf32>
    %cst_14 = arith.constant dense<0xFF800000> : vector<8xf32>
    %15 = vector.multi_reduction <maximumf>, %14, %cst_14 [1] : vector<8x8xf32> to vector<8xf32>
    %16 = vector.shape_cast %15 : vector<8xf32> to vector<8x1xf32>
    %17 = vector.broadcast %16 : vector<8x1xf32> to vector<8x8xf32>
    %18 = arith.subf %14, %17 : vector<8x8xf32>
    %19 = math.exp %18 : vector<8x8xf32>
    %cst_15 = arith.constant dense<0.000000e+00> : vector<8xf32>
    %20 = vector.multi_reduction <add>, %19, %cst_15 [1] : vector<8x8xf32> to vector<8xf32>
    %21 = vector.shape_cast %20 : vector<8xf32> to vector<8x1xf32>
    %cst_16 = arith.constant 1.000000e+00 : f32
    %22 = vector.broadcast %cst_16 : f32 to vector<8x1xf32>
    %23 = arith.divf %22, %21 : vector<8x1xf32>
    %24 = vector.broadcast %23 : vector<8x1xf32> to vector<8x8xf32>
    %25 = arith.mulf %19, %24 : vector<8x8xf32>
    %cst_17 = arith.constant dense<0.000000e+00> : vector<8x32xf32>
    %26 = tpu.matmul %25, %7, %cst_17 {dimension_numbers = #tpu.dot_dimension_numbers<[1], [0], [0], [1], [0, 0, 1, 1], [], []>} : vector<8x8xf32>, vector<8x32xf32>, vector<8x32xf32> -> vector<8x32xf32>
    %c0_18 = arith.constant 0 : index
    %c0_19 = arith.constant 0 : index
    %c0_20 = arith.constant 0 : index
    %27 = vector.load %arg6[%c0_18, %c0_19, %c0_20] : memref<1x8x32xf32, #tpu.memory_space<vmem>>, vector<1x8x32xf32>
    %28 = vector.shape_cast %27 : vector<1x8x32xf32> to vector<8x32xf32>
    %29 = vector.shape_cast %26 : vector<8x32xf32> to vector<1x8x32xf32>
    tpu.vector_store %arg6[%c0_18, %c0_19, %c0_20], %29 {strides = array<i32>} : memref<1x8x32xf32, #tpu.memory_space<vmem>>, vector<1x8x32xf32>,
    %c0_21 = arith.constant 0 : index
    %c0_22 = arith.constant 0 : index
    %c0_23 = arith.constant 0 : index
    %30 = vector.load %arg7[%c0_21, %c0_22, %c0_23] : memref<1x8x8xf32, #tpu.memory_space<vmem>>, vector<1x8x8xf32>
    %31 = vector.shape_cast %30 : vector<1x8x8xf32> to vector<8x8xf32>
    %32 = vector.shape_cast %25 : vector<8x8xf32> to vector<1x8x8xf32>
    tpu.vector_store %arg7[%c0_21, %c0_22, %c0_23], %32 {strides = array<i32>} : memref<1x8x8xf32, #tpu.memory_space<vmem>>, vector<1x8x8xf32>,
    return
  }
  func.func @transform_0(%arg0: i32, %arg1: i32) -> (i32, i32, i32) {
    %c0_i32 = arith.constant 0 : i32
    %c0_i32_0 = arith.constant 0 : i32
    return %arg0, %arg1, %c0_i32 : i32, i32, i32
  }
  func.func @transform_1(%arg0: i32, %arg1: i32) -> (i32, i32, i32) {
    %c0_i32 = arith.constant 0 : i32
    %c0_i32_0 = arith.constant 0 : i32
    %c0_i32_1 = arith.constant 0 : i32
    return %arg0, %c0_i32, %c0_i32_0 : i32, i32, i32
  }
  func.func @transform_2(%arg0: i32, %arg1: i32) -> (i32, i32, i32) {
    %c0_i32 = arith.constant 0 : i32
    %c0_i32_0 = arith.constant 0 : i32
    %c0_i32_1 = arith.constant 0 : i32
    return %arg0, %c0_i32, %c0_i32_0 : i32, i32, i32
  }
  func.func @transform_3(%arg0: i32, %arg1: i32) -> (i32, i32, i32) {
    %c0_i32 = arith.constant 0 : i32
    %c0_i32_0 = arith.constant 0 : i32
    return %arg0, %arg1, %c0_i32 : i32, i32, i32
  }
  func.func @transform_4(%arg0: i32, %arg1: i32) -> (i32, i32, i32) {
    %c0_i32 = arith.constant 0 : i32
    %c0_i32_0 = arith.constant 0 : i32
    return %arg0, %arg1, %c0_i32 : i32, i32, i32
  }
  func.func @transform_5(%arg0: i32, %arg1: i32) -> (i32, i32, i32) {
    %c0_i32 = arith.constant 0 : i32
    %c0_i32_0 = arith.constant 0 : i32
    return %arg0, %arg1, %c0_i32 : i32, i32, i32
  }
}

</mosaic_0001>

<bundles_post_ra>
// kernel: tpu_custom_call.1
= control target key start
LH: loop header
LB: loop body
LE: loop exit
PB: predicated region body
PF: predicated region fallthrough
CT: control target
= control target key end

     0   :  { %s1509_s0 = inlined_call_operand.hbm [shape: f32[8,8,32], index: 0, kind: input, shape index: {}]   ;;  %s1510_s1 = inlined_call_operand.hbm [shape: f32[8,8,32], index: 1, kind: input, shape index: {}]   ;;  %s1511_s2 = inlined_call_operand.hbm [shape: f32[8,8,32], index: 2, kind: input, shape index: {}]   ;;  %s1512_s3 = inlined_call_operand.hbm [shape: f32[8,8,8], index: 3, kind: input, shape index: {}]   ;;  %s1513_s4 = inlined_call_operand.hbm [shape: f32[8,8,32], index: 4, kind: output, shape index: {0}]   ;;  %s1514_s5 = inlined_call_operand.hbm [shape: f32[8,8,8], index: 5, kind: output, shape index: {1}]  }
   0x1   :  { %1524 = sst [smem:[#allocation24_spill]] %s1510_s1 }
   0x2   :  { %11 = vsyncpa [#allocation3], 0 }
   0x3   :  { %13 = vsyncpa [#allocation3 + $0x1], 0 }
   0x4   :  { %14 = vsyncpa [#allocation6], 0 }
   0x5   :  { %16 = vsyncpa [#allocation6 + $0x1], 0 }
   0x6   :  { %17 = vsyncpa [#allocation9], 0 }
   0x7   :  { %19 = vsyncpa [#allocation9 + $0x1], 0 }
   0x8   :  { %20 = vsyncpa [#allocation4], 0 }
   0x9   :  { %22 = vsyncpa [#allocation4 + $0x1], 0 }
   0xa   :  { %23 = vsyncpa [#allocation12], 0 }
   0xb   :  { %25 = vsyncpa [#allocation12 + $0x1], 0  ;;  %s1179_s18 = smov 0   ;;  %s1181_s19 = smov 0  }
   0xc   :  { %s1183_s20 = smov 0   ;;  %s1185_s21 = smov 0  }
   0xd   :  { %s1187_s22 = smov 0   ;;  %s1189_s23 = smov 0  }
   0xe LB: > { %1525 = sst [smem:[#allocation18_spill]] %s1119_s18  ;;  %s1210_s24 = sadd.s32 4294967295, %s1139_s23   ;;  %s1139_s23 = sphi %s1189_s23, %s31_s23   ;;  %s1135_s22 = sphi %s1187_s22, %s1552_s22   ;;  %s1131_s21 = sphi %s1185_s21, %s1551_s21   ;;  %s1127_s20 = sphi %s1183_s20, %s1550_s20   ;;  %s1123_s19 = sphi %s1181_s19, %s1554_s19   ;;  %s1119_s18 = sphi %s1179_s18, %s1553_s18  }
   0xf   : > { %1526 = sst [smem:[#allocation19_spill]] %s1127_s20  ;;  %s768_s25 = sadd.s32 4294967294, %s1139_s23  }
  0x10   : > { %1527 = sst [smem:[#allocation20_spill]] %s1135_s22  ;;  %s43_s26 = sadd.s32 1, %s1135_s22 }
  0x11   : > { %s52_s27 = sadd.s32 1, %s1127_s20  ;;  %p45_p0 = scmp.ge.s32.totalorder %s43_s26, 8 }
  0x12   : > { %p59_p1 = scmp.ne.s32.totalorder %s1127_s20, %s1123_s19  ;;  %p60_p2 = scmp.eq.s32.totalorder %s1139_s23, 0 }
  0x13   : > { %p65_p3 = scmp.ne.s32.totalorder %s1123_s19, %s1119_s18  ;;  %s1556_s26 = smov (%p45_p0, %s43_s26), 0 }
  0x14   : > { %1528 = sst [smem:[#allocation21_spill]] %s1556_s26  ;;  %p1222_p4 = por %p60_p2, %p59_p1 }
  0x15   : > { %p66_p5 = scmp.eq.s32.totalorder %s1210_s24, 0  ;;  %s47_s29 = ssub.s32 %s1135_s22, %s1556_s26 }
  0x16   : > { %p171_p6 = scmp.eq.s32.totalorder %s1210_s24, 7  ;;  %p50_p7 = scmp.eq.s32.totalorder %s47_s29, 0 }
  0x17   : > { %p1230_p8 = por %p66_p5, %p65_p3  ;;  %p177_p10 = scmp.eq.s32.totalorder %s768_s25, 7 }
  0x18   : > { %p1234_p9 = por %p171_p6, %p59_p1  ;;  %p841_p12 = scmp.lt.s32.totalorder %s1139_s23, 8 }
  0x19   : > { %s1530_s30 = scalar_select %p1230_p8, 1, 0 }
  0x1a   : > { %s1531_s6 = scalar_select %p1234_p9, 1, 0 }
  0x1b   : > { %s1239_s7 = scalar_select %p50_p7, %s1127_s20, %s52_s27  }
  0x1c   : > { %p1241_p11 = por %p177_p10, %p65_p3  ;;  %s1247_s9 = sand.u32 1, %s1127_s20  }
  0x1d   : > { %1532 = sst [smem:[#allocation22_spill]] %s1239_s7  ;;  %s1250_s10 = sshll.u32 %s1247_s9, 3 }
  0x1e   : > { %s1533_s8 = scalar_select %p1241_p11, 1, 0 }
  0x1f   : > { %s1253_s11 = sshll.u32 %s1135_s22, 7  ;;  %p1257_p13 = pnand %p841_p12, %p1222_p4 }
  0x20   : > { %1534 = sst [smem:[#allocation23_spill]] %s1533_s8  ;;  %s244_s13 = sand.u32 1, %s1139_s23  }
  0x21   : > { %s1535_s12 = scalar_select %p1257_p13, 1, 0 }
  0x22   : > { %s1536_s1 = sld [smem:[#allocation24_spill]]  ;;  %s248_s17 = scalar_lea.vmem [#allocation5], %s1250_s10 }
  0x23   : > { %s255_s25 = sshll.u32 %s248_s17, 4  ;;  %s1273_s27 = scalar_lea.sflag [#allocation6], %s244_s13  ;;  %s1270_s25 = int_to_ptr.vmem [resolvable:$true] %s255_s25 }
  0x24   : > { %p1279_p3 = pneg %p1257_p13 }
  0x28   : > { %s1266_s16 = scalar_lea.hbm %s1536_s1, %s1253_s11  ;;  %s902_s17 = scalar_lea.hbm %s1536_s1, 1024 }
  0x29   : > { %s897_s28 = scalar_lea.hbm %s1266_s16, 128  ;;  %p903_p6 = scmp.lt.u32.totalorder %s1266_s16, %s1536_s1 }
  0x2a   : > { %p898_p2 = scmp.ne.s32.totalorder %s1266_s16, %s897_s28  ;;  %p904_p7 = scmp.lt.u32.totalorder %s902_s17, %s897_s28 }
  0x2b   : > { %p906_p12 = scmp.lt.u32.totalorder %s897_s28, %s1266_s16 }
  0x2c   : > { %p900_p4 = pnand %p1279_p3, %p898_p2  ;;  %p905_p10 = por %p904_p7, %p903_p6 }
  0x2e   : > { %p901_p5 = pneg %p900_p4  ;;  %p907_p0 = por %p906_p12, %p905_p10 }
  0x30   : > { %p908_p1 = pnand %p907_p0, %p901_p5 }
  0x32   : > { %911 = shalt.err (!%p908_p1)
}
  0x33   : > { %s912_s13 = scalar_lea.vmem %s1270_s25, 128  ;;  %s1141_s14 = smov [#allocation5]  }
  0x34   : > { %p913_p2 = scmp.ne.s32.totalorder %s1270_s25, %s912_s13  ;;  %s917_s15 = sshll.u32 %s1141_s14, 4  ;;  %s918_s15 = int_to_ptr.vmem [resolvable:$false] %s917_s15 }
  0x35   : > { %s919_s22 = scalar_lea.vmem %s918_s15, 256  ;;  %p920_p9 = scmp.lt.s32.totalorder %s1270_s25, %s918_s15 }
  0x36   : > { %p915_p4 = pnand %p913_p2, %p1279_p3  ;;  %p921_p8 = scmp.lt.s32.totalorder %s919_s22, %s912_s13 }
  0x38   : > { %p916_p11 = pneg %p915_p4  ;;  %p922_p6 = por %p921_p8, %p920_p9 }
  0x3a   : > { %p923_p7 = pnand %p922_p6, %p916_p11 }
  0x3c   : > { %926 = shalt.err (!%p923_p7)
}
  0x3d   : > { %827 = dma.hbm_to_vmem [thread:$0]  (!%p1257_p13), %s1266_s16, 128, %s1270_s25, %s1273_s27  }
  0x3e   : > { %p1538_p0 = scmp.lt.s32.totalorder %s1139_s23, 9  ;;  %p1539_p1 = scmp.ge.s32.totalorder %s1139_s23, 1 }
  0x3f   : > { %s1315_s13 = scalar_lea.hbm %s1509_s0, %s1253_s11  ;;  %s229_s14 = scalar_lea.vmem [#allocation2], %s1250_s10 }
  0x40   : > { %p1307_p5 = pnand %p1539_p1, %p1538_p0  ;;  %s237_s15 = sshll.u32 %s229_s14, 4  ;;  %s1318_s15 = int_to_ptr.vmem [resolvable:$true] %s237_s15 }
  0x41   : > { %s1324_s22 = scalar_lea.hbm %s1511_s2, %s1253_s11  ;;  %s226_s1 = scalar_lea.sflag [#allocation3], %s1247_s9 }
  0x42   : > { %s1540_s26 = scalar_select %p1307_p5, 1, 0 }
  0x43   : > { %s927_s7 = scalar_lea.hbm %s1315_s13, 128  ;;  %s932_s20 = scalar_lea.hbm %s1509_s0, 1024 }
  0x44   : > { %p928_p8 = scmp.ne.s32.totalorder %s1315_s13, %s927_s7  ;;  %p933_p10 = scmp.lt.u32.totalorder %s1315_s13, %s1509_s0 }
  0x45   : > { %p934_p12 = scmp.lt.u32.totalorder %s932_s20, %s927_s7  ;;  %p936_p4 = scmp.lt.u32.totalorder %s927_s7, %s1315_s13 }
  0x46   : > { %p930_p9 = pnand %p928_p8, %p1279_p3 }
  0x47   : > { %p935_p2 = por %p934_p12, %p933_p10 }
  0x48   : > { %p931_p11 = pneg %p930_p9 }
  0x49   : > { %p937_p6 = por %p936_p4, %p935_p2 }
  0x4b   : > { %p938_p7 = pnand %p937_p6, %p931_p11 }
  0x4d   : > { %941 = shalt.err (!%p938_p7)
}
  0x4e   : > { %s942_s14 = scalar_lea.vmem %s1318_s15, 128  ;;  %s1142_s16 = smov [#allocation2]  }
  0x4f   : > { %p943_p0 = scmp.ne.s32.totalorder %s1318_s15, %s942_s14  ;;  %s947_s25 = sshll.u32 %s1142_s16, 4  ;;  %s948_s25 = int_to_ptr.vmem [resolvable:$false] %s947_s25 }
  0x50   : > { %s949_s18 = scalar_lea.vmem %s948_s25, 256  ;;  %p950_p9 = scmp.lt.s32.totalorder %s1318_s15, %s948_s25 }
  0x51   : > { %p945_p1 = pnand %p943_p0, %p1279_p3  ;;  %p951_p5 = scmp.lt.s32.totalorder %s949_s18, %s942_s14 }
  0x53   : > { %p946_p8 = pneg %p945_p1  ;;  %p952_p10 = por %p951_p5, %p950_p9 }
  0x55   : > { %p953_p12 = pnand %p952_p10, %p946_p8 }
  0x57   : > { %956 = shalt.err (!%p953_p12)
}
  0x58   : > { %824 = dma.hbm_to_vmem [thread:$0]  (!%p1257_p13), %s1315_s13, 128, %s1318_s15, %s226_s1  }
  0x59   : > { %s266_s20 = scalar_lea.vmem [#allocation7], %s1250_s10  ;;  %s957_s8 = scalar_lea.hbm %s1324_s22, 128 }
  0x5a   : > { %s273_s7 = sshll.u32 %s266_s20, 4  ;;  %p958_p11 = scmp.ne.s32.totalorder %s1324_s22, %s957_s8  ;;  %s274_s7 = int_to_ptr.vmem [resolvable:$true] %s273_s7 }
  0x5b   : > { %s962_s14 = scalar_lea.hbm %s1511_s2, 1024  ;;  %p963_p4 = scmp.lt.u32.totalorder %s1324_s22, %s1511_s2 }
  0x5c   : > { %p960_p5 = pnand %p958_p11, %p1279_p3  ;;  %p964_p6 = scmp.lt.u32.totalorder %s962_s14, %s957_s8 }
  0x5d   : > { %p966_p0 = scmp.lt.u32.totalorder %s957_s8, %s1324_s22 }
  0x5e   : > { %p961_p2 = pneg %p960_p5  ;;  %p965_p7 = por %p964_p6, %p963_p4 }
  0x60   : > { %p967_p1 = por %p966_p0, %p965_p7 }
  0x62   : > { %p968_p8 = pnand %p967_p1, %p961_p2 }
  0x64   : > { %971 = shalt.err (!%p968_p8)
}
  0x65   : > { %s972_s1 = scalar_lea.vmem %s274_s7, 128  ;;  %s1143_s13 = smov [#allocation7]  }
  0x66   : > { %p973_p9 = scmp.ne.s32.totalorder %s274_s7, %s972_s1  ;;  %s977_s15 = sshll.u32 %s1143_s13, 4  ;;  %s978_s15 = int_to_ptr.vmem [resolvable:$false] %s977_s15 }
  0x67   : > { %s979_s18 = scalar_lea.vmem %s978_s15, 256  ;;  %p980_p11 = scmp.lt.s32.totalorder %s274_s7, %s978_s15 }
  0x68   : > { %p975_p10 = pnand %p973_p9, %p1279_p3  ;;  %p981_p5 = scmp.lt.s32.totalorder %s979_s18, %s972_s1 }
  0x6a   : > { %p976_p12 = pneg %p975_p10  ;;  %p982_p13 = por %p981_p5, %p980_p11 }
  0x6c   : > { %p983_p4 = pnand %p982_p13, %p976_p12 }
  0x6e   : > { %986 = shalt.err (!%p983_p4)
}
  0x6f   : > { %p1541_p6 = scmp.ne.s32.totalorder %s1535_s12, 0  ;;  %s1371_s28 = scalar_lea.hbm %s1512_s3, %s1253_s11 }
  0x70   : > { %s284_s17 = scalar_lea.vmem [#allocation8], %s1250_s10  ;;  %s281_s16 = scalar_lea.sflag [#allocation9], %s1247_s9 }
  0x71   : > { %830 = dma.hbm_to_vmem [thread:$0]  (!%p1541_p6), %s1324_s22, 128, %s274_s7, %s1273_s27  }
  0x72   : > { %s292_s14 = sshll.u32 %s284_s17, 4  ;;  %s987_s25 = scalar_lea.hbm %s1371_s28, 128  ;;  %s293_s14 = int_to_ptr.vmem [resolvable:$true] %s292_s14 }
  0x73   : > { %p988_p13 = scmp.ne.s32.totalorder %s1371_s28, %s987_s25  ;;  %s992_s22 = scalar_lea.hbm %s1512_s3, 1024 }
  0x74   : > { %p993_p0 = scmp.lt.u32.totalorder %s1371_s28, %s1512_s3  ;;  %p994_p1 = scmp.lt.u32.totalorder %s992_s22, %s987_s25 }
  0x75   : > { %p990_p2 = pnand %p988_p13, %p1279_p3  ;;  %p996_p9 = scmp.lt.u32.totalorder %s987_s25, %s1371_s28 }
  0x76   : > { %p995_p8 = por %p994_p1, %p993_p0 }
  0x77   : > { %p991_p7 = pneg %p990_p2 }
  0x78   : > { %p997_p10 = por %p996_p9, %p995_p8 }
  0x7a   : > { %p998_p12 = pnand %p997_p10, %p991_p7 }
  0x7c   : > { %1001 = shalt.err (!%p998_p12)
}
  0x7d   : > { %s1002_s9 = scalar_lea.vmem %s293_s14, 128  ;;  %s1144_s10 = smov [#allocation8]  }
  0x7e   : > { %p1003_p11 = scmp.ne.s32.totalorder %s293_s14, %s1002_s9  ;;  %s1007_s13 = sshll.u32 %s1144_s10, 4  ;;  %s1008_s13 = int_to_ptr.vmem [resolvable:$false] %s1007_s13 }
  0x7f   : > { %s1009_s15 = scalar_lea.vmem %s1008_s13, 256  ;;  %p1010_p13 = scmp.lt.s32.totalorder %s293_s14, %s1008_s13 }
  0x80   : > { %p1005_p5 = pnand %p1003_p11, %p1279_p3  ;;  %p1011_p2 = scmp.lt.s32.totalorder %s1009_s15, %s1002_s9 }
  0x82   : > { %p1006_p4 = pneg %p1005_p5  ;;  %p1012_p6 = por %p1011_p2, %p1010_p13 }
  0x84   : > { %p1013_p0 = pnand %p1012_p6, %p1006_p4 }
  0x86   : > { %1016 = shalt.err (!%p1013_p0)
}
  0x87   : > { %p1542_p1 = scmp.ne.s32.totalorder %s1535_s12, 0  ;;  %p1543_p7 = scmp.ne.s32.totalorder %s1540_s26, 0 }
  0x88   : > { %s1395_s29 = sand.u32 (!%p1543_p7), 1, %s1123_s19   ;;  %p1544_p3 = scmp.ne.s32.totalorder (!%p1543_p7), %s1530_s30, 0 }
  0x89   : > { %833 = dma.hbm_to_vmem [thread:$0]  (!%p1542_p1), %s1371_s28, 128, %s293_s14, %s281_s16  }
  0x8a   : > { %301 = sbr.rel (%p1543_p7) target bundleno = 911 (0x38f), region = 36  ;;  %s1398_s18 = sshll.u32 (!%p1543_p7), %s1395_s29, 3 }
  0x8b   : > { %s304_s20 = scalar_lea.sflag (!%p1543_p7), [#allocation3], %s1395_s29  ;;  %s307_s8 = scalar_lea.vmem (!%p1543_p7), [#allocation2], %s1398_s18 }
  0x91   : > { %1098 = dma.done.wait (%p1544_p3), %s304_s20, 128  }
  0x92   : > { %1100 = vsyncadd (%p1544_p3), %s304_s20, 4294967168  ;;  %s312_s12 = sand.u32 1, %s1210_s24   ;;  %s316_s28 = scalar_lea.vmem [#allocation5], %s1398_s18 }
  0x93   : > { %s313_s26 = scalar_lea.sflag [#allocation6], %s312_s12 }
  0x94   : > { %1102 = dma.done.wait (%p1544_p3), %s313_s26, 256  }
  0x95   : > { %1104 = vsyncadd (%p1544_p3), %s313_s26, 4294967040  ;;  %s325_s17 = scalar_lea.vmem [#allocation7], %s1398_s18  ;;  %s331_s14 = scalar_lea.sflag [#allocation9], %s1395_s29 }
  0x96   : > { %s334_s16 = scalar_lea.vmem [#allocation8], %s1398_s18 }
  0x97   : > { %1106 = dma.done.wait (%p1544_p3), %s331_s14, 128  }
  0x98   : > { %1108 = vsyncadd (%p1544_p3), %s331_s14, 4294967168  ;;  %v1145_v0 = vmov 0.0   ;;  %vm1146_vm0 = vmmov 0   ;;  %vm386_vm1 = vcmask 261120   ;;  %v383_v1 = vld [vmem:[%s316_s28] sm:$0xff]  ;;  %v381_v2 = vld [vmem:[%s307_s8] sm:$0xff] }
  0x99   : > { %799 = vmatprep.subr.mxu0 %v1145_v0  ;;  %801 = vmatprep.mubr.msk.f32.mxu0 %vm1146_vm0, %v1145_v0  ;;  %v382_v3 = vmul.f32 0.17677669, %v381_v2  ;;  %v385_v4 = vld [vmem:[%s334_s16] sm:$0xff]  ;;  %vm465_vm3 = vcmask 64512   ;;  %v384_v14 = vld [vmem:[%s325_s17] sm:$0xff]  ;;  %s380_s24 = scalar_lea.vmem [#allocation11], %s1398_s18 }
  0x9a   : > { %804 = vmatprep.subr.mxu1 %v1145_v0  ;;  %806 = vmatprep.mubr.msk.f32.mxu1 %vm1146_vm0, %v1145_v0  ;;  %vm463_vm2 = vcmp.ne.f32.partialorder %v385_v4, 0.0  ;;  %s791_s30 = sshll.u32 %s1131_s21, 7  ;;  %s587_s22 = sshll.u32 %s380_s24, 4  ;;  %s588_s22 = int_to_ptr.vmem [resolvable:$true] %s587_s22 }
  0x9b   : > { %800 = vmatpush3.xpose.msk.msra.mxu0 %vm386_vm1, %v383_v1  ;;  %805 = vmatpush3.msra.mxu1 %v384_v14  ;;  %s1434_s27 = scalar_lea.hbm %s1514_s5, %s791_s30  ;;  %s559_s7 = scalar_lea.sflag [#allocation12], %s1395_s29 }
  0x9c   : > { %s1017_s11 = scalar_lea.vmem %s588_s22, 128  ;;  %p1545_p8 = scmp.ne.s32.totalorder %s1531_s6, 0 }
  0x9d   : > { %p1018_p6 = scmp.ne.s32.totalorder %s588_s22, %s1017_s11  ;;  %s1147_s9 = smov [#allocation11]  }
  0x9e   : > { %802 = vmatmul.mubr.msk.f32.vlgmr.msra.gmra.mrb[0].mxu0 %vm386_vm1, %v382_v3  ;;  %s1021_s10 = sshll.u32 %s1147_s9, 4  ;;  %s1022_s10 = int_to_ptr.vmem [resolvable:$false] %s1021_s10 }
  0x9f   : > { %p1019_p9 = pnand %p1018_p6, %p1545_p8  ;;  %s1023_s13 = scalar_lea.vmem %s1022_s10, 256 }
  0xa0   : > { %p1024_p12 = scmp.lt.s32.totalorder %s588_s22, %s1022_s10  ;;  %p1025_p11 = scmp.lt.s32.totalorder %s1023_s13, %s1017_s11 }
  0xa1   : > { %p1020_p10 = pneg %p1019_p9 }
  0xa2   : > { %p1026_p5 = por %p1025_p11, %p1024_p12 }
  0xa4   : > { %p1027_p4 = pnand %p1026_p5, %p1020_p10 }
 0x171   : > { %v459_v5 = vpop.f32.mrb[0].mxu0 }
 0x172   : > { %v464_v6 = vsel %vm463_vm2, %v459_v5, -1e+09  ;;  %v803_v7 = vpop.f32.mrb[1].mxu0 }
 0x173   : > { %v466_v8 = vsel %vm465_vm3, %v464_v6, -inf }
 0x174   : > { %467 = vmax.xlane.f32.xlu0 %v466_v8 }
 0x201   : > { %v468_v9 = vpop.xlane.xlu0 %467 }
 0x202   : > { %v469_v10 = vsub.f32 %v464_v6, %v468_v9 }
 0x204   : > { %v470_v11 = vmul.f32 1.442695, %v469_v10 }
 0x206   : > { %893 = vpow2.f32 %v470_v11 }
 0x210   : > { %v894_v12 = vpop.eup %893 }
 0x211   : > { %v472_v13 = vsel %vm465_vm3, %v894_v12, 0.0 }
 0x212   : > { %473 = vadd.xlane.f32.xlu0 %v472_v13 }
 0x29f   : > { %v474_v15 = vpop.xlane.xlu0 %473 }
 0x2a0   : > { %895 = vrcp.f32 %v474_v15 }
 0x2aa   : > { %v896_v16 = vpop.eup %895 }
 0x2ab   : > { %v477_v17 = vmul.f32 %v896_v16, %v894_v12 }
 0x2ad   : > { %807 = vmatmul.mubr.msk.f32.vlgmr.msra.gmra.mrb[0].mxu1 %vm465_vm3, %v477_v17  ;;  %552 = vst.msk [vmem:[%s380_s24] sm:$0xff] %vm465_vm3, %v477_v17 }
 0x2ae   : > { %1030 = shalt.err (!%p1027_p4)
}
 0x2af   : > { %s1031_s15 = scalar_lea.hbm %s1434_s27, 128  ;;  %s1035_s12 = scalar_lea.hbm %s1514_s5, 1024 }
 0x2b0   : > { %p1032_p13 = scmp.ne.s32.totalorder %s1434_s27, %s1031_s15  ;;  %p1036_p1 = scmp.lt.u32.totalorder %s1434_s27, %s1514_s5 }
 0x2b1   : > { %p1037_p7 = scmp.lt.u32.totalorder %s1035_s12, %s1031_s15  ;;  %p1039_p6 = scmp.lt.u32.totalorder %s1031_s15, %s1434_s27 }
 0x2b2   : > { %p1033_p2 = pnand %p1032_p13, %p1545_p8 }
 0x2b3   : > { %p1038_p3 = por %p1037_p7, %p1036_p1 }
 0x2b4   : > { %p1034_p0 = pneg %p1033_p2 }
 0x2b5   : > { %p1040_p9 = por %p1039_p6, %p1038_p3 }
 0x2b7   : > { %p1041_p10 = pnand %p1040_p9, %p1034_p0 }
 0x2b9   : > { %1044 = shalt.err (!%p1041_p10)
}
 0x2ba   : > { %818 = dma.vmem_to_hbm [thread:$0]  (%p1545_p8), %s588_s22, 128, %s1434_s27, %s559_s7  }
 0x2bb   : > { %s373_s17 = scalar_lea.vmem [#allocation10], %s1398_s18  ;;  %s1460_s25 = scalar_lea.hbm %s1513_s4, %s791_s30 }
 0x2bc   : > { %s573_s14 = sshll.u32 %s373_s17, 4  ;;  %s554_s1 = scalar_lea.sflag [#allocation4], %s1395_s29  ;;  %s1462_s14 = int_to_ptr.vmem [resolvable:$true] %s573_s14 }
 0x2bd   : > { %s1045_s11 = scalar_lea.vmem %s1462_s14, 128  ;;  %s1148_s21 = smov [#allocation10]  }
 0x2be   : > { %p1046_p12 = scmp.ne.s32.totalorder %s1462_s14, %s1045_s11  ;;  %s1049_s18 = sshll.u32 %s1148_s21, 4  ;;  %s1050_s18 = int_to_ptr.vmem [resolvable:$false] %s1049_s18 }
 0x2bf   : > { %s1051_s30 = scalar_lea.vmem %s1050_s18, 256  ;;  %p1052_p4 = scmp.lt.s32.totalorder %s1462_s14, %s1050_s18 }
 0x2c0   : > { %p1047_p11 = pnand %p1046_p12, %p1545_p8  ;;  %p1053_p13 = scmp.lt.s32.totalorder %s1051_s30, %s1045_s11 }
 0x2c2   : > { %p1048_p5 = pneg %p1047_p11  ;;  %p1054_p2 = por %p1053_p13, %p1052_p4 }
 0x2c4   : > { %p1055_p0 = pnand %p1054_p2, %p1048_p5 }
 0x380   : > { %v547_v18 = vpop.f32.mrb[0].mxu1 }
 0x381   : > { %551 = vst.msk [vmem:[%s373_s17] sm:$0xff] %vm386_vm1, %v547_v18  ;;  %v808_v19 = vpop.f32.mrb[1].mxu1 }
 0x382   : > { %1058 = shalt.err (!%p1055_p0)
}
 0x383   : > { %s1059_s29 = scalar_lea.hbm %s1460_s25, 128  ;;  %s1063_s7 = scalar_lea.hbm %s1513_s4, 1024 }
 0x384   : > { %p1060_p1 = scmp.ne.s32.totalorder %s1460_s25, %s1059_s29  ;;  %p1064_p6 = scmp.lt.u32.totalorder %s1460_s25, %s1513_s4 }
 0x385   : > { %p1065_p9 = scmp.lt.u32.totalorder %s1063_s7, %s1059_s29  ;;  %p1067_p12 = scmp.lt.u32.totalorder %s1059_s29, %s1460_s25 }
 0x386   : > { %p1061_p7 = pnand %p1060_p1, %p1545_p8 }
 0x387   : > { %p1066_p10 = por %p1065_p9, %p1064_p6 }
 0x388   : > { %p1062_p3 = pneg %p1061_p7 }
 0x389   : > { %p1068_p11 = por %p1067_p12, %p1066_p10 }
 0x38b   : > { %p1069_p5 = pnand %p1068_p11, %p1062_p3 }
 0x38d   : > { %1072 = shalt.err (!%p1069_p5)
}
 0x38e   : > { %817 = dma.vmem_to_hbm [thread:$0]  (%p1545_p8), %s1462_s14, 128, %s1460_s25, %s554_s1  }
 0x38f PF: > { %s1546_s13 = sld [smem:[#allocation18_spill]]  ;;  %s1547_s15 = sld [smem:[#allocation23_spill]] }
 0x390   : > { %p842_p4 = scmp.ge.s32.totalorder %s1139_s23, 2 }
 0x395   : > { %s599_s20 = sand.u32 1, %s1546_s13   ;;  %p1548_p13 = scmp.ne.s32.totalorder %s1547_s15, 0 }
 0x396   : > { %s600_s8 = scalar_lea.sflag [#allocation4], %s599_s20 }
 0x397   : > { %p835_p2 = pnand %p842_p4, %p1548_p13 }
 0x399   : > { %1110 = dma.done.wait (!%p835_p2), %s600_s8, 128  }
 0x39a   : > { %1112 = vsyncadd (!%p835_p2), %s600_s8, 4294967168  ;;  %s609_s12 = scalar_lea.sflag [#allocation12], %s599_s20 }
 0x39b   : > { %1114 = dma.done.wait (!%p835_p2), %s609_s12, 128  }
 0x39c   : > { %1116 = vsyncadd (!%p835_p2), %s609_s12, 4294967168  ;;  %s31_s23 = sadd.s32 1, %s1139_s23   ;;  %s1549_s6 = sld [smem:[#allocation19_spill]] }
 0x39d   : > { %p28_p0 = scmp.ge.s32.totalorder %s31_s23, 10   ;;  %s1550_s20 = sld [smem:[#allocation22_spill]] }
 0x39e   : > { %s1551_s21 = sld [smem:[#allocation20_spill]]  ;;  %s1552_s22 = sld [smem:[#allocation21_spill]] }
 0x39f   : > { %s1553_s18 = smov %s1123_s19  ;;  %30 = sbr.rel (!%p28_p0) target bundleno = 14 (0xe), region = 135 }
 0x3a2   : > { %s1554_s19 = smov %s1549_s6 }
 0x3a6   :  { %614 = vsyncpa [#allocation3], 1 }
 0x3a7   :  { %616 = vsyncpa [#allocation3 + $0x1], 1 }
 0x3a8   :  { %617 = vsyncpa [#allocation6], 1 }
 0x3a9   :  { %619 = vsyncpa [#allocation6 + $0x1], 1 }
 0x3aa   :  { %620 = vsyncpa [#allocation9], 1 }
 0x3ab   :  { %622 = vsyncpa [#allocation9 + $0x1], 1 }
 0x3ac   :  { %623 = vsyncpa [#allocation4], 1 }
 0x3ad   :  { %625 = vsyncpa [#allocation4 + $0x1], 1 }
 0x3ae   :  { %626 = vsyncpa [#allocation12], 1 }
 0x3af   :  { %628 = vsyncpa [#allocation12 + $0x1], 1 }

</bundles_post_ra>
